<compile_context>
chip_gen: v6e
topology: v6e:2x2x1
jax: 0.10.0
libtpu: 0.0.40
codegen_flags: <defaults>
</compile_context>

<pallas_src>
import jax
import jax.numpy as jnp
from jax.experimental import pallas as pl
from jax.experimental.pallas import tpu as pltpu


def residual_linear_kernel(x_ref, w_ref, b_ref, o_ref):
    # x_ref block: (tm, C) rows (flattened batch*seq), f32
    x = x_ref[...]

    # fn = Linear(C, C): MXU matmul in bf16 with f32 accumulation.
    y = jnp.dot(x.astype(jnp.bfloat16), w_ref[...],
                preferred_element_type=jnp.float32)
    y = y + b_ref[...]                       # (1, C) bias broadcast (f32)

    # Residual skip connection: + x (f32), then cast to the output dtype.
    o_ref[...] = (y + x.astype(jnp.float32)).astype(o_ref.dtype)


def residual_linear(x, w, b, *, tm=128):
    """out = x @ w + b + x, with x of shape (B, N, C)."""
    B, N, C = x.shape
    M = B * N
    x2 = x.reshape(M, C)

    # Pad the row dimension up to a multiple of the row tile.
    Mp = pl.cdiv(M, tm) * tm
    if Mp != M:
        x2 = jnp.pad(x2, ((0, Mp - M), (0, 0)))

    out = pl.pallas_call(
        residual_linear_kernel,
        out_shape=jax.ShapeDtypeStruct((Mp, C), x.dtype),
        grid=(Mp // tm,),
        in_specs=[
            pl.BlockSpec((tm, C), lambda i: (i, 0)),   # x rows: one tile per step
            pl.BlockSpec((C, C), lambda i: (0, 0)),    # W (grid-invariant, bf16)
            pl.BlockSpec((1, C), lambda i: (0, 0)),    # bias (grid-invariant)
        ],
        out_specs=pl.BlockSpec((tm, C), lambda i: (i, 0)),
        compiler_params=pltpu.CompilerParams(
            dimension_semantics=("parallel",)),        # independent row tiles
    )(x2, w.astype(jnp.bfloat16), b.reshape(1, C))

    if Mp != M:
        out = out[:M]
    return out.reshape(B, N, C)


def residual_ref(x, w, b):
    # pure-JAX f32 reference: fn(x) + x with fn = Linear(C, C)
    return (x @ w + b + x).astype(x.dtype)


if __name__ == "__main__":
    # Small but lane-dense shapes: C = 128 (full vreg lane width), B*N = 256
    # rows -> 2 grid steps of a full 128-row MXU tile.
    B, N, C = 2, 128, 128

    key = jax.random.PRNGKey(0)
    kx, kw, kb = jax.random.split(key, 3)

    x = jax.random.normal(kx, (B, N, C), dtype=jnp.float32)

    # fn = Linear(C, C) parameters, deterministic init.
    w = jax.random.normal(kw, (C, C), dtype=jnp.float32) / jnp.sqrt(C)
    b = 0.1 * jax.random.normal(kb, (C,), dtype=jnp.float32)

    out = residual_linear(x, w, b)
    out = jax.block_until_ready(out)

    ref = residual_ref(x, w, b)
    # Tolerance loosened for bf16 MXU inputs (f32 accumulation).
    assert jnp.allclose(out, ref, atol=5e-2, rtol=5e-2), "mismatch vs reference"

    print("KERNEL_OK")
</pallas_src>

<mosaic_0001>
module attributes {stable_mosaic.version = 11 : i64} {
  func.func @residual_linear_kernel(%arg0: i32, %arg1: memref<128x128xf32, #tpu.memory_space<vmem>>, %arg2: memref<128x128xbf16, #tpu.memory_space<vmem>>, %arg3: memref<1x128xf32, #tpu.memory_space<vmem>>, %arg4: memref<128x128xf32, #tpu.memory_space<vmem>>) attributes {dimension_semantics = [#tpu.dimension_semantics<parallel>], iteration_bounds = array<i64: 2>, scalar_prefetch = 0 : i64, scratch_operands = 0 : i64, tpu.core_type = #tpu.core_type<tc>, window_params = [{transform_indices = @transform_0, window_bounds = array<i64: 128, 128>}, {pipeline_mode = #tpu.pipeline_mode<synchronous>, transform_indices = @transform_1, window_bounds = array<i64: 128, 128>}, {pipeline_mode = #tpu.pipeline_mode<synchronous>, transform_indices = @transform_2, window_bounds = array<i64: 1, 128>}, {transform_indices = @transform_3, window_bounds = array<i64: 128, 128>}]} {
    %c0 = arith.constant 0 : index
    %c0_0 = arith.constant 0 : index
    %0 = vector.load %arg1[%c0, %c0_0] : memref<128x128xf32, #tpu.memory_space<vmem>>, vector<128x128xf32>
    %1 = arith.truncf %0 : vector<128x128xf32> to vector<128x128xbf16>
    %c0_1 = arith.constant 0 : index
    %c0_2 = arith.constant 0 : index
    %2 = vector.load %arg2[%c0_1, %c0_2] : memref<128x128xbf16, #tpu.memory_space<vmem>>, vector<128x128xbf16>
    %cst = arith.constant dense<0.000000e+00> : vector<128x128xf32>
    %3 = tpu.matmul %1, %2, %cst {dimension_numbers = #tpu.dot_dimension_numbers<[1], [0], [0], [1], [0, 0, 1, 1], [], []>} : vector<128x128xbf16>, vector<128x128xbf16>, vector<128x128xf32> -> vector<128x128xf32>
    %c0_3 = arith.constant 0 : index
    %c0_4 = arith.constant 0 : index
    %4 = vector.load %arg3[%c0_3, %c0_4] : memref<1x128xf32, #tpu.memory_space<vmem>>, vector<1x128xf32>
    %5 = vector.broadcast %4 : vector<1x128xf32> to vector<128x128xf32>
    %6 = arith.addf %3, %5 : vector<128x128xf32>
    %7 = arith.addf %6, %0 : vector<128x128xf32>
    %c0_5 = arith.constant 0 : index
    %c0_6 = arith.constant 0 : index
    %8 = vector.load %arg4[%c0_5, %c0_6] : memref<128x128xf32, #tpu.memory_space<vmem>>, vector<128x128xf32>
    tpu.vector_store %arg4[%c0_5, %c0_6], %7 {strides = array<i32>} : memref<128x128xf32, #tpu.memory_space<vmem>>, vector<128x128xf32>,
    return
  }
  func.func @transform_0(%arg0: i32) -> (i32, i32) {
    %c0_i32 = arith.constant 0 : i32
    %c0_i32_0 = arith.constant 0 : i32
    return %arg0, %c0_i32 : i32, i32
  }
  func.func @transform_1(%arg0: i32) -> (i32, i32) {
    %c0_i32 = arith.constant 0 : i32
    %c0_i32_0 = arith.constant 0 : i32
    %c0_i32_1 = arith.constant 0 : i32
    return %c0_i32, %c0_i32_0 : i32, i32
  }
  func.func @transform_2(%arg0: i32) -> (i32, i32) {
    %c0_i32 = arith.constant 0 : i32
    %c0_i32_0 = arith.constant 0 : i32
    %c0_i32_1 = arith.constant 0 : i32
    return %c0_i32, %c0_i32_0 : i32, i32
  }
  func.func @transform_3(%arg0: i32) -> (i32, i32) {
    %c0_i32 = arith.constant 0 : i32
    %c0_i32_0 = arith.constant 0 : i32
    return %arg0, %c0_i32 : i32, i32
  }
}

</mosaic_0001>

<bundles_post_ra>
// kernel: tpu_custom_call.1
= control target key start
LH: loop header
LB: loop body
LE: loop exit
PB: predicated region body
PF: predicated region fallthrough
CT: control target
= control target key end

     0   :  { %8 = vsyncpa [#allocation3], 0  ;;  %s1104_s0 = inlined_call_operand.hbm [shape: f32[256,128], index: 0, kind: input, shape index: {}]   ;;  %s1105_s1 = inlined_call_operand.hbm [shape: bf16[128,128], index: 1, kind: input, shape index: {}]   ;;  %s1106_s2 = inlined_call_operand.vmem [shape: f32[1,128], index: 2, kind: input, shape index: {}]   ;;  %s1107_s3 = inlined_call_operand.hbm [shape: f32[256,128], index: 3, kind: output, shape index: {}]  }
   0x1   :  { %10 = vsyncpa [#allocation3 + $0x1], 0 }
   0x2   :  { %11 = vsyncpa [#allocation6], 0 }
   0x3   :  { %12 = vsyncpa [#allocation4], 0 }
   0x4   :  { %14 = vsyncpa [#allocation4 + $0x1], 0  ;;  %s843_s12 = smov 0   ;;  %s845_s13 = smov 0  }
   0x5   :  { %s847_s14 = smov 0   ;;  %s849_s15 = smov 0  }
   0x6 LB: > { %s864_s16 = sadd.s32 4294967295, %s812_s15   ;;  %s528_s17 = sadd.s32 4294967294, %s812_s15   ;;  %s812_s15 = sphi %s849_s15, %s1129_s15   ;;  %s808_s14 = sphi %s847_s14, %s1128_s14   ;;  %s804_s13 = sphi %s845_s13, %s1127_s13   ;;  %s800_s12 = sphi %s843_s12, %s1126_s12  }
   0x7   : > { %p40_p0 = scmp.ne.s32.totalorder %s804_s13, %s800_s12  ;;  %p1108_p1 = scmp.eq.s32.totalorder %s864_s16, 0 }
   0x8   : > { %p112_p3 = scmp.eq.s32.totalorder %s528_s17, 1  ;;  %p529_p5 = scmp.ge.s32.totalorder %s812_s15, 1 }
   0x9   : > { %p873_p4 = por %p1108_p1, %p40_p0  ;;  %p119_p7 = scmp.lt.s32.totalorder %s812_s15, 3 }
   0xa   : > { %p878_p6 = por %p112_p3, %p40_p0  ;;  %s814_s21 = smov [#allocation5]  }
   0xb   : > { %s1112_s18 = scalar_select %p873_p4, 1, 0 }
   0xc   : > { %s1113_s19 = scalar_select %p878_p6, 1, 0 }
   0xd   : > { %p883_p8 = pnand %p529_p5, %p119_p7  ;;  %s131_s22 = sshll.u32 %s814_s21, 4  ;;  %s132_s22 = int_to_ptr.vmem [resolvable:$true] %s131_s22 }
   0xe   : > { %s897_s24 = sadd.s32 1, %s812_s15   ;;  %s27_s25 = sadd.s32 1, %s808_s14 }
   0xf   : > { %s1114_s20 = scalar_select %p883_p8, 1, 0 }
  0x10   : > { %p627_p9 = pneg %p883_p8  ;;  %s24_s26 = ssub.s32 %s812_s15, %s897_s24 }
  0x11   : > { %s701_s27 = scalar_lea.vmem %s132_s22, 1024  ;;  %p709_p5 = scmp.lt.s32.totalorder %s132_s22, %s132_s22 }
  0x12   : > { %p892_p11 = pnand %p627_p9, %p1108_p1  ;;  %p702_p13 = scmp.ne.s32.totalorder %s132_s22, %s701_s27 }
  0x13   : > { %p710_p7 = scmp.lt.s32.totalorder %s701_s27, %s701_s27 }
  0x14   : > { %p692_p12 = pneg %p892_p11 }
  0x15   : > { %p711_p10 = por %p710_p7, %p709_p5 }
  0x16   : > { %p704_p0 = pnand %p702_p13, %p692_p12 }
  0x18   : > { %p705_p3 = pneg %p704_p0 }
  0x1a   : > { %p712_p2 = pnand %p711_p10, %p705_p3 }
  0x1c   : > { %715 = shalt.err (!%p712_p2)
}
  0x1d   : > { %s815_s28 = smov 64   ;;  %s816_s29 = smov 4  }
  0x1e   : > { %630 = dma.hbm_to_vmem [thread:$0]  (!%p892_p11), %s1105_s1, 1024, %s132_s22, [#allocation6], %s815_s28, %s815_s28, %s816_s29  }
  0x1f   : > { %p25_p9 = scmp.eq.s32.totalorder %s24_s26, 0  ;;  %p34_p12 = scmp.ne.s32.totalorder %s808_s14, %s804_s13 }
  0x20   : > { %p35_p10 = scmp.eq.s32.totalorder %s812_s15, 0  ;;  %p640_p2 = scmp.lt.s32.totalorder %s812_s15, 2 }
  0x21   : > { %s914_s5 = scalar_select %p25_p9, %s808_s14, %s27_s25  }
  0x22   : > { %p36_p13 = por %p35_p10, %p34_p12  ;;  %p1116_p0 = scmp.eq.s32.totalorder %s864_s16, 1 }
  0x23   : > { %s148_s7 = sand.u32 1, %s808_s14   ;;  %s553_s8 = sshll.u32 %s812_s15, 11 }
  0x24   : > { %p918_p3 = por %p1116_p0, %p34_p12  ;;  %s532_s9 = sshll.u32 %s148_s7, 7 }
  0x25   : > { %s927_s17 = scalar_lea.hbm %s1104_s0, %s553_s8  ;;  %s152_s21 = scalar_lea.vmem [#allocation2], %s532_s9 }
  0x26   : > { %s1117_s6 = scalar_select %p918_p3, 1, 0 }
  0x27   : > { %s159_s22 = sshll.u32 %s152_s21, 4  ;;  %p929_p11 = pnand %p640_p2, %p36_p13  ;;  %s933_s22 = int_to_ptr.vmem [resolvable:$true] %s159_s22 }
  0x28   : > { %s935_s25 = scalar_lea.sflag [#allocation3], %s148_s7  ;;  %s716_s26 = scalar_lea.hbm %s927_s17, 2048 }
  0x29   : > { %p717_p5 = scmp.ne.s32.totalorder %s927_s17, %s716_s26  ;;  %p718_p7 = pneg %p929_p11 }
  0x2a   : > { %s721_s29 = scalar_lea.hbm %s1104_s0, 4096  ;;  %p722_p10 = scmp.lt.s32.totalorder %s927_s17, %s1104_s0 }
  0x2b   : > { %p719_p9 = pnand %p718_p7, %p717_p5  ;;  %p723_p2 = scmp.lt.s32.totalorder %s721_s29, %s716_s26 }
  0x2d   : > { %p720_p12 = pneg %p719_p9  ;;  %p724_p13 = por %p723_p2, %p722_p10 }
  0x2f   : > { %p725_p0 = pnand %p724_p13, %p720_p12 }
  0x31   : > { %728 = shalt.err (!%p725_p0)
}
  0x32   : > { %s729_s7 = scalar_lea.vmem %s933_s22, 2048  ;;  %s817_s8 = smov [#allocation2]  }
  0x33   : > { %p730_p1 = scmp.ne.s32.totalorder %s933_s22, %s729_s7  ;;  %s734_s9 = sshll.u32 %s817_s8, 4  ;;  %s735_s9 = int_to_ptr.vmem [resolvable:$false] %s734_s9 }
  0x34   : > { %s736_s10 = scalar_lea.vmem %s735_s9, 4096  ;;  %p737_p9 = scmp.lt.s32.totalorder %s933_s22, %s735_s9 }
  0x35   : > { %p732_p6 = pnand %p730_p1, %p718_p7  ;;  %p738_p3 = scmp.lt.s32.totalorder %s736_s10, %s729_s7 }
  0x37   : > { %p733_p5 = pneg %p732_p6  ;;  %p739_p4 = por %p738_p3, %p737_p9 }
  0x39   : > { %p740_p8 = pnand %p739_p4, %p733_p5 }
  0x3b   : > { %743 = shalt.err (!%p740_p8)
}
  0x3c   : > { %s818_s11 = smov 128   ;;  %s819_s21 = smov 8  }
  0x3d   : > { %634 = dma.hbm_to_vmem [thread:$0]  (!%p929_p11), %s927_s17, 2048, %s933_s22, %s935_s25, %s818_s11, %s818_s11, %s819_s21  }
  0x3e   : > { %p1119_p1 = scmp.ne.s32.totalorder %s1114_s20, 0 }
  0x3f   : > { %s959_s26 = sand.u32 (!%p1119_p1), 1, %s804_s13   ;;  %p1120_p4 = scmp.ne.s32.totalorder (!%p1119_p1), %s1112_s18, 0 }
  0x40   : > { %171 = sbr.rel (%p1119_p1) target bundleno = 331 (0x14b), region = 32  ;;  %s536_s27 = sshll.u32 (!%p1119_p1), %s959_s26, 7 }
  0x41   : > { %s174_s28 = scalar_lea.sflag (!%p1119_p1), [#allocation3], %s959_s26  ;;  %s965_s29 = scalar_lea.vmem (!%p1119_p1), [#allocation2], %s536_s27 }
  0x45   : > { %787 = dma.done.wait (%p1120_p4), %s174_s28, 2048  }
  0x46   : > { %789 = vsyncadd (%p1120_p4), %s174_s28, 4294965248  ;;  %p1121_p6 = scmp.eq.s32.totalorder %s864_s16, 0 }
  0x48   : > { %791 = dma.done.wait (%p1121_p6), [#allocation6], 1024   ;;  %p1122_p8 = pmov %p1121_p6 }
  0x49   : > { %v682_v0 = vld [vmem:[#allocation5 + $0x38] sm:$0xff]   ;;  %v683_v1 = vld [vmem:[#allocation5 + $0x30] sm:$0xff]   ;;  %v684_v2 = vld [vmem:[#allocation5 + $0x28] sm:$0xff]   ;;  %s1026_s17 = scalar_lea.vmem [#allocation7], %s536_s27  ;;  %s554_s22 = sshll.u32 %s864_s16, 11 }
  0x4a   : > { %793 = vsyncadd (%p1122_p8), [#allocation6], 4294966272  ;;  %571 = vmatprep.subr.bf16.mxu0 %v682_v0  ;;  %603 = vmatprep.subr.bf16.mxu1 %v682_v0  ;;  %v685_v3 = vld [vmem:[#allocation5 + $0x20] sm:$0xff]   ;;  %v979_v5 = vld [vmem:[%s965_s29 + $0x8] sm:$0xff]  ;;  %s445_s23 = sshll.u32 %s1026_s17, 4  ;;  %s1053_s4 = scalar_lea.hbm %s1107_s3, %s554_s22  ;;  %s1055_s23 = int_to_ptr.vmem [resolvable:$true] %s445_s23 }
  0x4b   : > { %572 = vmatpush3.bf16.msra.mxu0 %v682_v0  ;;  %611 = vmatpush3.bf16.msra.mxu1 %v682_v0  ;;  %v976_v4 = vld [vmem:[%s965_s29] sm:$0xff]  ;;  %v987_v8 = vld [vmem:[%s965_s29 + $0x48] sm:$0xff]  ;;  %v686_v10 = vld [vmem:[#allocation5 + $0x18] sm:$0xff]   ;;  %s432_s16 = scalar_lea.sflag [#allocation4], %s959_s26  ;;  %s744_s7 = scalar_lea.vmem %s1055_s23, 2048 }
  0x4c   : > { %573 = vmatprep.subr.bf16.mxu0 %v683_v1  ;;  %604 = vmatprep.subr.bf16.mxu1 %v683_v1  ;;  %v982_v6 = vld [vmem:[%s965_s29 + $0x40] sm:$0xff]  ;;  %v223_v7 = vpack.c.bf16 %v979_v5, %v976_v4  ;;  %v687_v11 = vld [vmem:[#allocation5 + $0x10] sm:$0xff]   ;;  %v688_v12 = vld [vmem:[#allocation5 + $0x8] sm:$0xff]   ;;  %p745_p3 = scmp.ne.s32.totalorder %s1055_s23, %s744_s7  ;;  %p1123_p11 = scmp.ne.s32.totalorder %s1117_s6, 0 }
  0x4d   : > { %v227_v9 = vpack.c.bf16 %v987_v8, %v982_v6  ;;  %v689_v13 = vld [vmem:[#allocation5] sm:$0xff]   ;;  %v209_v14 = vld [vmem:[%s965_s29 + $0x10] sm:$0xff]  ;;  %v210_v15 = vld [vmem:[%s965_s29 + $0x18] sm:$0xff]  ;;  %s820_s8 = smov [#allocation7]  }
  0x4e   : > { %587 = vmatprep.mubr.bf16.mxu0 %v223_v7  ;;  %v217_v16 = vld [vmem:[%s965_s29 + $0x50] sm:$0xff]  ;;  %v218_v17 = vld [vmem:[%s965_s29 + $0x58] sm:$0xff]  ;;  %v996_v18 = vld [vmem:[%s965_s29 + $0x20] sm:$0xff]  ;;  %v224_v22 = vpack.c.bf16 %v210_v15, %v209_v14  ;;  %p746_p7 = pnand %p745_p3, %p1123_p11  ;;  %s748_s9 = sshll.u32 %s820_s8, 4  ;;  %s749_s9 = int_to_ptr.vmem [resolvable:$false] %s748_s9 }
  0x4f   : > { %574 = vmatpush3.bf16.msra.mxu0 %v683_v1  ;;  %612 = vmatpush3.bf16.msra.mxu1 %v683_v1  ;;  %v999_v19 = vld [vmem:[%s965_s29 + $0x28] sm:$0xff]  ;;  %v1002_v20 = vld [vmem:[%s965_s29 + $0x60] sm:$0xff]  ;;  %v228_v23 = vpack.c.bf16 %v218_v17, %v217_v16  ;;  %v213_v26 = vld [vmem:[%s965_s29 + $0x30] sm:$0xff]  ;;  %s750_s10 = scalar_lea.vmem %s749_s9, 4096  ;;  %p751_p10 = scmp.lt.s32.totalorder %s1055_s23, %s749_s9 }
  0x50   : > { %575 = vmatprep.subr.bf16.mxu0 %v684_v2  ;;  %605 = vmatprep.subr.bf16.mxu1 %v684_v2  ;;  %v1005_v21 = vld [vmem:[%s965_s29 + $0x68] sm:$0xff]  ;;  %v225_v24 = vpack.c.bf16 %v999_v19, %v996_v18  ;;  %v1013_v27 = vld [vmem:[%s965_s29 + $0x38] sm:$0xff]  ;;  %v221_v28 = vld [vmem:[%s965_s29 + $0x70] sm:$0xff]  ;;  %p747_p12 = pneg %p746_p7  ;;  %p752_p2 = scmp.lt.s32.totalorder %s750_s10, %s744_s7 }
  0x51   : > { %595 = vmatprep.mubr.bf16.mxu1 %v227_v9  ;;  %v229_v25 = vpack.c.bf16 %v1005_v21, %v1002_v20  ;;  %v1017_v29 = vld [vmem:[%s965_s29 + $0x78] sm:$0xff]  ;;  %v226_v30 = vpack.c.bf16 %v1013_v27, %v213_v26  ;;  %v539_v32 = vld [vmem:[%s1106_s2] ss:$0 sm:$0xff] }
  0x52   : > { %v230_v31 = vpack.c.bf16 %v1017_v29, %v221_v28  ;;  %p753_p13 = por %p752_p2, %p751_p10 }
  0x53   : > { %576 = vmatpush3.bf16.msra.mxu0 %v684_v2  ;;  %613 = vmatpush3.bf16.msra.mxu1 %v684_v2 }
  0x54   : > { %577 = vmatprep.subr.bf16.mxu0 %v685_v3  ;;  %606 = vmatprep.subr.bf16.mxu1 %v685_v3  ;;  %p754_p0 = pnand %p753_p13, %p747_p12 }
  0x57   : > { %578 = vmatpush3.bf16.msra.mxu0 %v685_v3  ;;  %614 = vmatpush3.bf16.msra.mxu1 %v685_v3 }
  0x58   : > { %579 = vmatprep.subr.bf16.mxu0 %v686_v10  ;;  %607 = vmatprep.subr.bf16.mxu1 %v686_v10 }
  0x5b   : > { %580 = vmatpush3.bf16.msra.mxu0 %v686_v10  ;;  %615 = vmatpush3.bf16.msra.mxu1 %v686_v10 }
  0x5c   : > { %581 = vmatprep.subr.bf16.mxu0 %v687_v11  ;;  %608 = vmatprep.subr.bf16.mxu1 %v687_v11 }
  0x5f   : > { %582 = vmatpush3.bf16.msra.mxu0 %v687_v11  ;;  %616 = vmatpush3.bf16.msra.mxu1 %v687_v11 }
  0x60   : > { %583 = vmatprep.subr.bf16.mxu0 %v688_v12  ;;  %609 = vmatprep.subr.bf16.mxu1 %v688_v12 }
  0x63   : > { %584 = vmatpush3.bf16.msra.mxu0 %v688_v12  ;;  %617 = vmatpush3.bf16.msra.mxu1 %v688_v12 }
  0x64   : > { %585 = vmatprep.subr.bf16.mxu0 %v689_v13  ;;  %610 = vmatprep.subr.bf16.mxu1 %v689_v13 }
  0x67   : > { %586 = vmatpush3.bf16.msra.mxu0 %v689_v13  ;;  %618 = vmatpush3.bf16.msra.mxu1 %v689_v13 }
  0x6a   : > { %588 = vmatmul.mubr.bf16.vlgmr.msra.gmra.mxu0 %v224_v22  ;;  %596 = vmatmul.mubr.bf16.vlgmr.msra.gmra.mxu1 %v228_v23 }
  0x6b   : > { %591 = vmatprep.mubr.bf16.mxu0 %v225_v24  ;;  %599 = vmatprep.mubr.bf16.mxu1 %v229_v25 }
  0x72   : > { %592 = vmatmul.mubr.bf16.gmra.mxu0 %v226_v30  ;;  %600 = vmatmul.mubr.bf16.gmra.mxu1 %v230_v31 }
 0x12a   : > { %v589_v33 = vpop.f32.mrf.mxu0  ;;  %v597_v34 = vpop.f32.mrf.mxu1 }
 0x12b   : > { %v345_v35 = vadd.f32 %v589_v33, %v539_v32  ;;  %v377_v36 = vadd.f32 %v597_v34, %v539_v32 }
 0x12c   : > { %v336_v37 = vpop.f32.mrf.mxu0  ;;  %v368_v38 = vpop.f32.mrf.mxu1 }
 0x12d   : > { %v401_v39 = vadd.f32 %v345_v35, %v209_v14  ;;  %v409_v40 = vadd.f32 %v377_v36, %v217_v16  ;;  %v337_v41 = vadd.f32 %v539_v32, %v336_v37  ;;  %v369_v42 = vadd.f32 %v539_v32, %v368_v38 }
 0x12e   : > { %v590_v43 = vpop.f32.mrf.mxu0  ;;  %v598_v44 = vpop.f32.mrf.mxu1 }
 0x12f   : > { %417 = vst [vmem:[%s1026_s17 + $0x10] sm:$0xff] %v401_v39  ;;  %425 = vst [vmem:[%s1026_s17 + $0x50] sm:$0xff] %v409_v40  ;;  %v399_v45 = vadd.f32 %v337_v41, %v976_v4  ;;  %v407_v46 = vadd.f32 %v369_v42, %v982_v6  ;;  %v348_v47 = vadd.f32 %v590_v43, %v539_v32 }
 0x130   : > { %v380_v48 = vadd.f32 %v598_v44, %v539_v32  ;;  %v339_v49 = vpop.f32.mrf.mxu0  ;;  %v371_v50 = vpop.f32.mrf.mxu1 }
 0x131   : > { %415 = vst [vmem:[%s1026_s17] sm:$0xff] %v399_v45  ;;  %423 = vst [vmem:[%s1026_s17 + $0x40] sm:$0xff] %v407_v46  ;;  %v402_v51 = vadd.f32 %v348_v47, %v210_v15  ;;  %v340_v53 = vadd.f32 %v539_v32, %v339_v49  ;;  %v372_v54 = vadd.f32 %v539_v32, %v371_v50 }
 0x132   : > { %v410_v52 = vadd.f32 %v380_v48, %v218_v17  ;;  %v593_v55 = vpop.f32.mrf.mxu0  ;;  %v601_v56 = vpop.f32.mrf.mxu1 }
 0x133   : > { %418 = vst [vmem:[%s1026_s17 + $0x18] sm:$0xff] %v402_v51  ;;  %v400_v57 = vadd.f32 %v340_v53, %v979_v5  ;;  %v408_v58 = vadd.f32 %v372_v54, %v987_v8  ;;  %v361_v59 = vadd.f32 %v593_v55, %v539_v32  ;;  %v393_v60 = vadd.f32 %v601_v56, %v539_v32 }
 0x134   : > { %426 = vst [vmem:[%s1026_s17 + $0x58] sm:$0xff] %v410_v52  ;;  %v352_v61 = vpop.f32.mrf.mxu0  ;;  %v384_v62 = vpop.f32.mrf.mxu1 }
 0x135   : > { %416 = vst [vmem:[%s1026_s17 + $0x8] sm:$0xff] %v400_v57  ;;  %424 = vst [vmem:[%s1026_s17 + $0x48] sm:$0xff] %v408_v58  ;;  %v405_v63 = vadd.f32 %v361_v59, %v213_v26  ;;  %v413_v0 = vadd.f32 %v393_v60, %v221_v28  ;;  %v353_v1 = vadd.f32 %v539_v32, %v352_v61 }
 0x136   : > { %v385_v2 = vadd.f32 %v539_v32, %v384_v62  ;;  %v594_v3 = vpop.f32.mrf.mxu0  ;;  %v602_v4 = vpop.f32.mrf.mxu1 }
 0x137   : > { %421 = vst [vmem:[%s1026_s17 + $0x30] sm:$0xff] %v405_v63  ;;  %429 = vst [vmem:[%s1026_s17 + $0x70] sm:$0xff] %v413_v0  ;;  %v403_v5 = vadd.f32 %v353_v1, %v996_v18  ;;  %v364_v7 = vadd.f32 %v594_v3, %v539_v32  ;;  %v396_v8 = vadd.f32 %v602_v4, %v539_v32 }
 0x138   : > { %v411_v6 = vadd.f32 %v385_v2, %v1002_v20  ;;  %v355_v9 = vpop.f32.mrf.mxu0  ;;  %v387_v10 = vpop.f32.mrf.mxu1 }
 0x139   : > { %419 = vst [vmem:[%s1026_s17 + $0x20] sm:$0xff] %v403_v5  ;;  %v406_v11 = vadd.f32 %v364_v7, %v1013_v27  ;;  %v414_v12 = vadd.f32 %v396_v8, %v1017_v29  ;;  %v356_v13 = vadd.f32 %v539_v32, %v355_v9  ;;  %v388_v14 = vadd.f32 %v539_v32, %v387_v10 }
 0x13a   : > { %427 = vst [vmem:[%s1026_s17 + $0x60] sm:$0xff] %v411_v6 }
 0x13b   : > { %422 = vst [vmem:[%s1026_s17 + $0x38] sm:$0xff] %v406_v11  ;;  %430 = vst [vmem:[%s1026_s17 + $0x78] sm:$0xff] %v414_v12  ;;  %v404_v15 = vadd.f32 %v356_v13, %v999_v19  ;;  %v412_v16 = vadd.f32 %v388_v14, %v1005_v21 }
 0x13d   : > { %420 = vst [vmem:[%s1026_s17 + $0x28] sm:$0xff] %v404_v15  ;;  %428 = vst [vmem:[%s1026_s17 + $0x68] sm:$0xff] %v412_v16 }
 0x13e   : > { %757 = shalt.err (!%p754_p0)
}
 0x13f   : > { %s758_s11 = scalar_lea.hbm %s1053_s4, 2048  ;;  %s762_s28 = scalar_lea.hbm %s1107_s3, 4096 }
 0x140   : > { %p759_p5 = scmp.ne.s32.totalorder %s1053_s4, %s758_s11  ;;  %p763_p4 = scmp.lt.s32.totalorder %s1053_s4, %s1107_s3 }
 0x141   : > { %p764_p6 = scmp.lt.s32.totalorder %s762_s28, %s758_s11 }
 0x142   : > { %p760_p9 = pnand %p759_p5, %p1123_p11 }
 0x143   : > { %p765_p8 = por %p764_p6, %p763_p4 }
 0x144   : > { %p761_p1 = pneg %p760_p9 }
 0x146   : > { %p766_p3 = pnand %p765_p8, %p761_p1 }
 0x148   : > { %769 = shalt.err (!%p766_p3)
}
 0x149   : > { %s821_s20 = smov 128   ;;  %s822_s17 = smov 8  }
 0x14a   : > { %625 = dma.vmem_to_hbm [thread:$0]  (%p1123_p11), %s1055_s23, 2048, %s1053_s4, %s432_s16, %s821_s20, %s821_s20, %s822_s17  }
 0x14b PF: > { %s460_s22 = sand.u32 1, %s800_s12   ;;  %p1124_p7 = scmp.ne.s32.totalorder %s1113_s19, 0 }
 0x14c   : > { %p1125_p12 = scmp.ge.s32.totalorder %s812_s15, 2  ;;  %s461_s25 = scalar_lea.sflag [#allocation4], %s460_s22 }
 0x14e   : > { %p636_p10 = pnand %p1125_p12, %p1124_p7 }
 0x150   : > { %p637_p2 = pneg %p636_p10 }
 0x152   : > { %795 = dma.done.wait (%p637_p2), %s461_s25, 2048  }
 0x153   : > { %797 = vsyncadd (%p637_p2), %s461_s25, 4294965248  ;;  %p17_p13 = scmp.ge.s32.totalorder %s897_s24, 4   ;;  %s1126_s12 = smov %s804_s13 }
 0x154   : > { %s1127_s13 = smov %s808_s14  ;;  %s1128_s14 = smov %s914_s5 }
 0x155   : > { %s1129_s15 = smov %s897_s24  ;;  %19 = sbr.rel (!%p17_p13) target bundleno = 6 (0x6), region = 81 }
 0x15a   :  { %466 = vsyncpa [#allocation3], 1 }
 0x15b   :  { %468 = vsyncpa [#allocation3 + $0x1], 1 }
 0x15c   :  { %469 = vsyncpa [#allocation6], 1 }
 0x15d   :  { %470 = vsyncpa [#allocation4], 1 }
 0x15e   :  { %472 = vsyncpa [#allocation4 + $0x1], 1 }

</bundles_post_ra>
